<compile_context>
chip_gen: v7x
topology: tpu7x:2x2x1
jax: 0.10.0
libtpu: 0.0.40
codegen_flags: <defaults>
</compile_context>

<pallas_src>
import jax
import jax.numpy as jnp
from jax.experimental import pallas as pl
from jax.experimental.pallas import tpu as pltpu

TEMP = 0.66


def _encoder_b_kernel(x_ref, w1b1_ref, w2b2_ref, g_ref, out_ref):
    """x_ref:    [bm, D+1]  labels with a trailing ones column (bias fold)
       w1b1_ref: [D+1, H]   W1 rows + bias row
       w2b2_ref: [H+1, z]   W2 rows + bias row (row H, sublane-aligned since H%8==0)
       g_ref:    [bm, z]    gumbel noise
       out_ref:  [2, bm, z] packed (logits, concrete sample)"""
    H = w2b2_ref.shape[0] - 1

    # ---- enc_hidden: Linear (+bias via ones column) + ReLU ----
    h = jnp.dot(x_ref[...], w1b1_ref[...], preferred_element_type=jnp.float32)
    h = jnp.maximum(h, 0.0)

    # ---- fc: Linear ----
    w2 = w2b2_ref[0:H, :]          # [H, z]   (aligned static slice)
    b2 = w2b2_ref[H:H + 1, :]      # [1, z]   (offset H = 256, sublane-aligned)
    logits = jnp.dot(h, w2, preferred_element_type=jnp.float32) + b2

    # ---- concrete (Gumbel-softmax) relaxed sample at temperature TEMP ----
    y = (logits + g_ref[...]) * (1.0 / TEMP)
    y = y - jnp.max(y, axis=-1, keepdims=True)
    e = jnp.exp(y)
    inv = pl.reciprocal(jnp.sum(e, axis=-1, keepdims=True), approx=True)  # EUP vrcp
    sample = e * inv

    # single packed output buffer -> one output DMA
    out_ref[0] = logits.astype(out_ref.dtype)
    out_ref[1] = sample.astype(out_ref.dtype)


def pack_encoder_b_params(w1, b1, w2, b2):
    """Pack biases into the weight slabs ONCE (not per call).
       w1: [D, H], b1: [1, H]  ->  w1b1: [D+1, H]
       w2: [H, z], b2: [1, z]  ->  w2b2: [H+1, z]"""
    w1b1 = jnp.concatenate([w1, b1], axis=0)
    w2b2 = jnp.concatenate([w2, b2], axis=0)
    return w1b1, w2b2


def encoder_b_forward(labels, w1b1, w2b2, gumbel, *, block_batch=1024):
    """labels: [B, D] f32 -> (shared_logit [B, z], concrete sample 'sharedB' [B, z])."""
    B, D = labels.shape
    H = w1b1.shape[1]
    z = w2b2.shape[1]

    # ones column folds b1 into the first matmul (extra K is free: MXU pads K to 128 anyway)
    labels_aug = jnp.concatenate(
        [labels, jnp.ones((B, 1), labels.dtype)], axis=-1)          # [B, D+1]

    # batch tiling: one block at the demo size, sharded across TensorCores when B scales
    bm = min(block_batch, B)
    if bm != B:
        bm = max(8, (bm // 8) * 8)          # keep sublane-aligned blocks
    grid = (pl.cdiv(B, bm),)

    cost = pl.CostEstimate(
        flops=int(2 * B * (D + 1) * H + 2 * B * H * z + 8 * B * z),
        transcendentals=int(B * z),
        bytes_accessed=int(4 * (B * (D + 1) + (D + 1) * H + (H + 1) * z
                                + B * z + 2 * B * z)),
    )

    out = pl.pallas_call(
        _encoder_b_kernel,
        out_shape=jax.ShapeDtypeStruct((2, B, z), jnp.float32),
        grid_spec=pltpu.PrefetchScalarGridSpec(
            num_scalar_prefetch=0,
            grid=grid,
            in_specs=[
                pl.BlockSpec((bm, D + 1), lambda i: (i, 0)),   # labels (+ones)
                pl.BlockSpec((D + 1, H), lambda i: (0, 0)),    # W1|b1  (broadcast)
                pl.BlockSpec((H + 1, z), lambda i: (0, 0)),    # W2|b2  (broadcast)
                pl.BlockSpec((bm, z), lambda i: (i, 0)),       # gumbel
            ],
            out_specs=pl.BlockSpec((2, bm, z), lambda i: (0, i, 0)),
        ),
        compiler_params=pltpu.CompilerParams(
            dimension_semantics=("parallel",)),                # megacore on v7x
        cost_estimate=cost,
    )(labels_aug, w1b1, w2b2, gumbel)

    return out[0], out[1]


def kaiming_like_init(key, fan_in, fan_out):
    """Deterministic stand-in for kaiming_init: N(0, sqrt(2/fan_in)) weights, zero bias.
    Returned weight is [fan_in, fan_out] (pre-transposed vs. torch's [out, in])."""
    std = (2.0 / fan_in) ** 0.5
    w = jax.random.normal(key, (fan_in, fan_out), dtype=jnp.float32) * std
    b = jnp.zeros((1, fan_out), dtype=jnp.float32)
    return w, b


if __name__ == "__main__":
    num_digis, num_hidden, zShared_dim = 10, 256, 10
    batch = 8

    key = jax.random.PRNGKey(0)
    k_x, k_w1, k_w2, k_g = jax.random.split(key, 4)

    # One-hot-ish label inputs (as EncoderB expects digit labels).
    idx = jax.random.randint(k_x, (batch,), 0, num_digis)
    labels = jax.nn.one_hot(idx, num_digis, dtype=jnp.float32)   # [B, num_digis]

    w1, b1 = kaiming_like_init(k_w1, num_digis, num_hidden)
    w2, b2 = kaiming_like_init(k_w2, num_hidden, zShared_dim)
    # Perturb biases away from zero so the bias-fold path is actually exercised
    # by the numeric check (kaiming_init itself zeroes biases).
    b1 = b1 + 0.05
    b2 = b2 - 0.03

    w1b1, w2b2 = pack_encoder_b_params(w1, b1, w2, b2)

    # Gumbel noise for the concrete relaxation (drawn in JAX, consumed in-kernel).
    gumbel = jax.random.gumbel(k_g, (batch, zShared_dim), dtype=jnp.float32)

    shared_logit, shared_sample = encoder_b_forward(labels, w1b1, w2b2, gumbel)
    jax.block_until_ready((shared_logit, shared_sample))

    # Cross-check against a pure-JAX reference.
    h_ref = jnp.maximum(labels @ w1 + b1, 0.0)
    logit_ref = h_ref @ w2 + b2
    sample_ref = jax.nn.softmax((logit_ref + gumbel) / TEMP, axis=-1)
    assert jnp.allclose(shared_logit, logit_ref, atol=1e-5), "logit mismatch"
    # approx reciprocal (EUP vrcp) -> loosened tolerance on the relaxed sample
    assert jnp.allclose(shared_sample, sample_ref, atol=5e-3), "sample mismatch"

    print("KERNEL_OK")
</pallas_src>

<mosaic_0001>
module attributes {stable_mosaic.version = 11 : i64} {
  func.func @_encoder_b_kernel(%arg0: i32, %arg1: memref<8x11xf32, #tpu.memory_space<vmem>>, %arg2: memref<11x256xf32, #tpu.memory_space<vmem>>, %arg3: memref<257x10xf32, #tpu.memory_space<vmem>>, %arg4: memref<8x10xf32, #tpu.memory_space<vmem>>, %arg5: memref<2x8x10xf32, #tpu.memory_space<vmem>>) attributes {dimension_semantics = [#tpu.dimension_semantics<parallel>], iteration_bounds = array<i64: 1>, scalar_prefetch = 0 : i64, scratch_operands = 0 : i64, tpu.core_type = #tpu.core_type<tc>, window_params = [{transform_indices = @transform_0, window_bounds = array<i64: 8, 11>}, {pipeline_mode = #tpu.pipeline_mode<synchronous>, transform_indices = @transform_1, window_bounds = array<i64: 11, 256>}, {pipeline_mode = #tpu.pipeline_mode<synchronous>, transform_indices = @transform_2, window_bounds = array<i64: 257, 10>}, {transform_indices = @transform_3, window_bounds = array<i64: 8, 10>}, {transform_indices = @transform_4, window_bounds = array<i64: 2, 8, 10>}]} {
    %c0 = arith.constant 0 : index
    %c0_0 = arith.constant 0 : index
    %0 = vector.load %arg1[%c0, %c0_0] : memref<8x11xf32, #tpu.memory_space<vmem>>, vector<8x11xf32>
    %c0_1 = arith.constant 0 : index
    %c0_2 = arith.constant 0 : index
    %1 = vector.load %arg2[%c0_1, %c0_2] : memref<11x256xf32, #tpu.memory_space<vmem>>, vector<11x256xf32>
    %cst = arith.constant dense<0.000000e+00> : vector<8x256xf32>
    %2 = tpu.matmul %0, %1, %cst {dimension_numbers = #tpu.dot_dimension_numbers<[1], [0], [0], [1], [0, 0, 1, 1], [], []>} : vector<8x11xf32>, vector<11x256xf32>, vector<8x256xf32> -> vector<8x256xf32>
    %cst_3 = arith.constant 0.000000e+00 : f32
    %3 = vector.broadcast %cst_3 : f32 to vector<8x256xf32>
    %4 = arith.maximumf %2, %3 : vector<8x256xf32>
    %c0_4 = arith.constant 0 : index
    %c0_5 = arith.constant 0 : index
    %5 = vector.load %arg3[%c0_4, %c0_5] : memref<257x10xf32, #tpu.memory_space<vmem>>, vector<256x10xf32>
    %c256 = arith.constant 256 : index
    %c0_6 = arith.constant 0 : index
    %6 = vector.load %arg3[%c256, %c0_6] : memref<257x10xf32, #tpu.memory_space<vmem>>, vector<1x10xf32>
    %cst_7 = arith.constant dense<0.000000e+00> : vector<8x10xf32>
    %7 = tpu.matmul %4, %5, %cst_7 {dimension_numbers = #tpu.dot_dimension_numbers<[1], [0], [0], [1], [0, 0, 1, 1], [], []>} : vector<8x256xf32>, vector<256x10xf32>, vector<8x10xf32> -> vector<8x10xf32>
    %8 = vector.broadcast %6 : vector<1x10xf32> to vector<8x10xf32>
    %9 = arith.addf %7, %8 : vector<8x10xf32>
    %c0_8 = arith.constant 0 : index
    %c0_9 = arith.constant 0 : index
    %10 = vector.load %arg4[%c0_8, %c0_9] : memref<8x10xf32, #tpu.memory_space<vmem>>, vector<8x10xf32>
    %11 = arith.addf %9, %10 : vector<8x10xf32>
    %cst_10 = arith.constant 1.5151515 : f32
    %12 = vector.broadcast %cst_10 : f32 to vector<8x10xf32>
    %13 = arith.mulf %11, %12 : vector<8x10xf32>
    %cst_11 = arith.constant dense<0xFF800000> : vector<8xf32>
    %14 = vector.multi_reduction <maximumf>, %13, %cst_11 [1] : vector<8x10xf32> to vector<8xf32>
    %15 = vector.shape_cast %14 : vector<8xf32> to vector<8x1xf32>
    %16 = vector.broadcast %15 : vector<8x1xf32> to vector<8x10xf32>
    %17 = arith.subf %13, %16 : vector<8x10xf32>
    %18 = math.exp %17 : vector<8x10xf32>
    %cst_12 = arith.constant dense<0.000000e+00> : vector<8xf32>
    %19 = vector.multi_reduction <add>, %18, %cst_12 [1] : vector<8x10xf32> to vector<8xf32>
    %20 = vector.shape_cast %19 : vector<8xf32> to vector<8x1xf32>
    %21 = tpu.reciprocal %20 {approx = true} : vector<8x1xf32> -> vector<8x1xf32>
    %22 = vector.broadcast %21 : vector<8x1xf32> to vector<8x10xf32>
    %23 = arith.mulf %18, %22 : vector<8x10xf32>
    %c0_13 = arith.constant 0 : index
    %c0_14 = arith.constant 0 : index
    %c0_15 = arith.constant 0 : index
    %24 = vector.load %arg5[%c0_13, %c0_14, %c0_15] : memref<2x8x10xf32, #tpu.memory_space<vmem>>, vector<1x8x10xf32>
    %25 = vector.shape_cast %24 : vector<1x8x10xf32> to vector<8x10xf32>
    %26 = vector.shape_cast %9 : vector<8x10xf32> to vector<1x8x10xf32>
    tpu.vector_store %arg5[%c0_13, %c0_14, %c0_15], %26 {strides = array<i32>} : memref<2x8x10xf32, #tpu.memory_space<vmem>>, vector<1x8x10xf32>,
    %c1 = arith.constant 1 : index
    %c0_16 = arith.constant 0 : index
    %c0_17 = arith.constant 0 : index
    %27 = vector.load %arg5[%c1, %c0_16, %c0_17] : memref<2x8x10xf32, #tpu.memory_space<vmem>>, vector<1x8x10xf32>
    %28 = vector.shape_cast %27 : vector<1x8x10xf32> to vector<8x10xf32>
    %29 = vector.shape_cast %23 : vector<8x10xf32> to vector<1x8x10xf32>
    tpu.vector_store %arg5[%c1, %c0_16, %c0_17], %29 {strides = array<i32>} : memref<2x8x10xf32, #tpu.memory_space<vmem>>, vector<1x8x10xf32>,
    return
  }
  func.func @transform_0(%arg0: i32) -> (i32, i32) {
    %c0_i32 = arith.constant 0 : i32
    %c0_i32_0 = arith.constant 0 : i32
    return %arg0, %c0_i32 : i32, i32
  }
  func.func @transform_1(%arg0: i32) -> (i32, i32) {
    %c0_i32 = arith.constant 0 : i32
    %c0_i32_0 = arith.constant 0 : i32
    %c0_i32_1 = arith.constant 0 : i32
    return %c0_i32, %c0_i32_0 : i32, i32
  }
  func.func @transform_2(%arg0: i32) -> (i32, i32) {
    %c0_i32 = arith.constant 0 : i32
    %c0_i32_0 = arith.constant 0 : i32
    %c0_i32_1 = arith.constant 0 : i32
    return %c0_i32, %c0_i32_0 : i32, i32
  }
  func.func @transform_3(%arg0: i32) -> (i32, i32) {
    %c0_i32 = arith.constant 0 : i32
    %c0_i32_0 = arith.constant 0 : i32
    return %arg0, %c0_i32 : i32, i32
  }
  func.func @transform_4(%arg0: i32) -> (i32, i32, i32) {
    %c0_i32 = arith.constant 0 : i32
    %c0_i32_0 = arith.constant 0 : i32
    %c0_i32_1 = arith.constant 0 : i32
    return %c0_i32, %arg0, %c0_i32_0 : i32, i32, i32
  }
}

</mosaic_0001>

<bundles_post_ra>
// kernel: tpu_custom_call.1
= control target key start
LH: loop header
LB: loop body
LE: loop exit
PB: predicated region body
PF: predicated region fallthrough
CT: control target
= control target key end

     0   :  { %vm27_vm0 = vcmask 1042432   ;;  %vm358_vm1 = vmmov 1   ;;  %v359_v6 = vmov 0.0   ;;  %vm23_vm3 = vcmask 89088   ;;  %s521_s0 = inlined_call_operand.vmem [shape: f32[8,11], index: 0, kind: input, shape index: {}]   ;;  %s522_s1 = inlined_call_operand.vmem [shape: f32[11,256], index: 1, kind: input, shape index: {}]   ;;  %s523_s2 = inlined_call_operand.vmem [shape: f32[257,10], index: 2, kind: input, shape index: {}]   ;;  %s524_s3 = inlined_call_operand.vmem [shape: f32[8,10], index: 3, kind: input, shape index: {}]   ;;  %s525_s4 = inlined_call_operand.hbm [shape: f32[2,8,10], index: 4, kind: output, shape index: {}]  }
   0x1   :  { %v20_v0 = vld [vmem:[%s522_s1 + $0x8] sm:$0xff]  ;;  %v22_v1 = vld [vmem:[%s522_s1 + $0x18] sm:$0x7]  ;;  %v19_v2 = vld [vmem:[%s522_s1] sm:$0xff]  ;;  %98 = vmatprep.mubr.f32.mxu0 %v359_v6 }
   0x2   :  { %v287_v3 = vpack.c.bf16 %v22_v1, %v20_v0  ;;  %vm288_vm2 = vmpackc.low %vm27_vm0, %vm358_vm1  ;;  %v21_v4 = vld [vmem:[%s522_s1 + $0x10] sm:$0x7]  ;;  %v18_v7 = vld [vmem:[%s521_s0] sm:$0xff] }
   0x3   :  { %v290_v5 = vpack.c.bf16 %v21_v4, %v19_v2  ;;  %v123_v8 = vld [vmem:[%s523_s2 + $0x80] sm:$0xff]  ;;  %v124_v9 = vld [vmem:[%s523_s2 + $0x88] sm:$0xff]  ;;  %v125_v13 = vld [vmem:[%s523_s2 + $0x90] sm:$0xff] }
   0x4   :  { %v107_v10 = vld [vmem:[%s523_s2] sm:$0xff]  ;;  %289 = vmatprep.subr.msk.bf16.mxu0 %vm288_vm2, %v287_v3  ;;  %v293_v11 = vpack.c.bf16 %v124_v9, %v123_v8  ;;  %v108_v12 = vld [vmem:[%s523_s2 + $0x8] sm:$0xff]  ;;  %v126_v14 = vld [vmem:[%s523_s2 + $0x98] sm:$0xff] }
   0x5   :  { %292 = vmatpush1.bf16.msk.msra.mxu0 %vm288_vm2, %v290_v5  ;;  %v295_v15 = vpack.c.bf16 %v108_v12, %v107_v10  ;;  %v297_v16 = vpack.c.bf16 %v126_v14, %v125_v13  ;;  %v109_v17 = vld [vmem:[%s523_s2 + $0x10] sm:$0xff]  ;;  %v110_v18 = vld [vmem:[%s523_s2 + $0x18] sm:$0xff]  ;;  %v127_v19 = vld [vmem:[%s523_s2 + $0xa0] sm:$0xff] }
   0x6   :  { %294 = vmatprep.subr.bf16.mxu1 %v293_v11  ;;  %v128_v20 = vld [vmem:[%s523_s2 + $0xa8] sm:$0xff]  ;;  %v299_v21 = vpack.c.bf16 %v110_v18, %v109_v17  ;;  %v111_v23 = vld [vmem:[%s523_s2 + $0x20] sm:$0xff]  ;;  %v129_v25 = vld [vmem:[%s523_s2 + $0xb0] sm:$0xff] }
   0x7   :  { %296 = vmatpush3.bf16.msra.mxu1 %v295_v15  ;;  %v301_v22 = vpack.c.bf16 %v128_v20, %v127_v19  ;;  %v112_v24 = vld [vmem:[%s523_s2 + $0x28] sm:$0xff]  ;;  %v130_v26 = vld [vmem:[%s523_s2 + $0xb8] sm:$0xff]  ;;  %v113_v29 = vld [vmem:[%s523_s2 + $0x30] sm:$0xff] }
   0x8   :  { %250 = vmatmul.mubr.msk.f32.vlgmr.msra.gmra.mrb[0].mxu0 %vm23_vm3, %v18_v7  ;;  %298 = vmatprep.subr.bf16.mxu1 %v297_v16  ;;  %v303_v27 = vpack.c.bf16 %v112_v24, %v111_v23  ;;  %v305_v28 = vpack.c.bf16 %v130_v26, %v129_v25  ;;  %v114_v30 = vld [vmem:[%s523_s2 + $0x38] sm:$0xff] }
   0xb   :  { %300 = vmatpush3.bf16.msra.mxu1 %v299_v21 }
   0xc   :  { %302 = vmatprep.subr.bf16.mxu1 %v301_v22 }
   0xd   :  { %9 = vsyncpa [#allocation3], 0  ;;  %v131_v31 = vld [vmem:[%s523_s2 + $0xc0] sm:$0xff]  ;;  %v132_v32 = vld [vmem:[%s523_s2 + $0xc8] sm:$0xff]  ;;  %v307_v33 = vpack.c.bf16 %v114_v30, %v113_v29  ;;  %vm217_vm4 = vcmask 80896  }
   0xe   :  { %v309_v34 = vpack.c.bf16 %v132_v32, %v131_v31  ;;  %v115_v35 = vld [vmem:[%s523_s2 + $0x40] sm:$0xff]  ;;  %v116_v36 = vld [vmem:[%s523_s2 + $0x48] sm:$0xff]  ;;  %v133_v37 = vld [vmem:[%s523_s2 + $0xd0] sm:$0xff] }
   0xf   :  { %304 = vmatpush3.bf16.msra.mxu1 %v303_v27  ;;  %v134_v38 = vld [vmem:[%s523_s2 + $0xd8] sm:$0xff]  ;;  %v311_v39 = vpack.c.bf16 %v116_v36, %v115_v35  ;;  %v117_v41 = vld [vmem:[%s523_s2 + $0x50] sm:$0xff]  ;;  %v135_v43 = vld [vmem:[%s523_s2 + $0xe0] sm:$0xff] }
  0x10   :  { %306 = vmatprep.subr.bf16.mxu1 %v305_v28  ;;  %v313_v40 = vpack.c.bf16 %v134_v38, %v133_v37  ;;  %v118_v42 = vld [vmem:[%s523_s2 + $0x58] sm:$0xff]  ;;  %v136_v44 = vld [vmem:[%s523_s2 + $0xe8] sm:$0xff]  ;;  %v119_v47 = vld [vmem:[%s523_s2 + $0x60] sm:$0xff] }
  0x11   :  { %v315_v45 = vpack.c.bf16 %v118_v42, %v117_v41  ;;  %v317_v46 = vpack.c.bf16 %v136_v44, %v135_v43  ;;  %v120_v48 = vld [vmem:[%s523_s2 + $0x68] sm:$0xff]  ;;  %v137_v50 = vld [vmem:[%s523_s2 + $0xf0] sm:$0xff]  ;;  %v138_v51 = vld [vmem:[%s523_s2 + $0xf8] sm:$0xff] }
  0x12   :  { %v319_v49 = vpack.c.bf16 %v120_v48, %v119_v47  ;;  %v321_v52 = vpack.c.bf16 %v138_v51, %v137_v50  ;;  %v121_v53 = vld [vmem:[%s523_s2 + $0x70] sm:$0xff]  ;;  %v122_v54 = vld [vmem:[%s523_s2 + $0x78] sm:$0xff]  ;;  %v251_v61 = vld [vmem:[%s523_s2 + $0x100] ss:$0 sm:$0xff]  ;;  %s360_s2 = smov [#allocation2]  }
  0x13   :  { %308 = vmatpush3.bf16.msra.mxu1 %v307_v33  ;;  %v323_v55 = vpack.c.bf16 %v122_v54, %v121_v53  ;;  %v214_v0 = vld [vmem:[%s524_s3] sm:$0xff]  ;;  %s237_s3 = sshll.u32 %s360_s2, 4  ;;  %s238_s3 = int_to_ptr.vmem [resolvable:$true] %s237_s3 }
  0x14   :  { %310 = vmatprep.subr.bf16.mxu1 %v309_v34  ;;  %s334_s9 = scalar_lea.vmem %s238_s3, 256  ;;  %p339_p1 = scmp.lt.s32.totalorder %s238_s3, %s238_s3 }
  0x15   :  { %p335_p0 = scmp.ne.s32.totalorder %s238_s3, %s334_s9  ;;  %p340_p2 = scmp.lt.s32.totalorder %s334_s9, %s334_s9 }
  0x17   :  { %312 = vmatpush3.bf16.msra.mxu1 %v311_v39  ;;  %p341_p3 = por %p340_p2, %p339_p1 }
  0x18   :  { %314 = vmatprep.subr.bf16.mxu1 %v313_v40 }
  0x19   :  { %p342_p4 = pnand %p341_p3, %p335_p0 }
  0x1b   :  { %316 = vmatpush3.bf16.msra.mxu1 %v315_v45 }
  0x1c   :  { %318 = vmatprep.subr.bf16.mxu1 %v317_v46 }
  0x1f   :  { %320 = vmatpush3.bf16.msra.mxu1 %v319_v49 }
  0x20   :  { %322 = vmatprep.subr.bf16.mxu1 %v321_v52 }
  0x23   :  { %324 = vmatpush3.bf16.msra.mxu1 %v323_v55 }
  0xdb   :  { %v100_v56 = vpop.f32.mrb[0].mxu0 }
  0xdc   :  { %v102_v57 = vpop.f32.mrb[1].mxu0  ;;  %v105_v59 = vmax.f32 %v100_v56, 0.0 }
  0xdd   :  { %v106_v58 = vmax.f32 %v102_v57, 0.0 }
  0xdf   :  { %208 = vmatprep.mubr.f32.mxu1 %v106_v58 }
  0xe0   :  { %209 = vmatmul.mubr.f32.vlgmr.msra.gmra.mrb[0].mxu1 %v105_v59 }
 0x1b3   :  { %v284_v60 = vpop.f32.mrb[0].mxu1 }
 0x1b4   :  { %v285_v62 = vpop.f32.mrb[1].mxu1 }
 0x1b5   :  { %v286_v63 = vadd.f32 %v285_v62, %v284_v60 }
 0x1b7   :  { %v211_v1 = vadd.f32 %v286_v63, %v251_v61 }
 0x1b9   :  { %v215_v2 = vadd.f32 %v214_v0, %v211_v1  ;;  %229 = vst.msk [vmem:[#allocation2] sm:$0xff] %vm217_vm4, %v211_v1 }
 0x1bb   :  { %v216_v3 = vmul.f32 1.5151515, %v215_v2 }
 0x1bd   :  { %v218_v4 = vsel %vm217_vm4, %v216_v3, -inf }
 0x1be   :  { %219 = vmax.xlane.f32.xlu0 %v218_v4 }
 0x24b   :  { %v220_v5 = vpop.xlane.xlu0 %219 }
 0x24c   :  { %v221_v6 = vsub.f32 %v216_v3, %v220_v5 }
 0x24e   :  { %v222_v7 = vmul.f32 1.442695, %v221_v6 }
 0x250   :  { %330 = vpow2.f32 %v222_v7 }
 0x25a   :  { %v331_v8 = vpop.eup %330 }
 0x25b   :  { %v224_v9 = vsel %vm217_vm4, %v331_v8, 0.0 }
 0x25c   :  { %225 = vadd.xlane.f32.xlu0 %v224_v9 }
 0x2e9   :  { %v226_v10 = vpop.xlane.xlu0 %225 }
 0x2ea   :  { %332 = vrcp.f32 %v226_v10 }
 0x2f4   :  { %v333_v11 = vpop.eup %332 }
 0x2f5   :  { %v228_v12 = vmul.f32 %v333_v11, %v331_v8 }
 0x2f7   :  { %231 = vst.msk [vmem:[#allocation2 + $0x8] sm:$0xff] %vm217_vm4, %v228_v12 }
 0x2f8   :  { %345 = shalt.err (!%p342_p4)
}
 0x2f9   :  { %s346_s12 = scalar_lea.hbm %s525_s4, 256 }
 0x2fa   :  { %p347_p5 = scmp.ne.s32.totalorder %s525_s4, %s346_s12  ;;  %p350_p6 = scmp.lt.u32.totalorder %s346_s12, %s525_s4 }
 0x2fc   :  { %p352_p7 = pnand %p350_p6, %p347_p5 }
 0x2fe   :  { %355 = shalt.err (!%p352_p7)
}
 0x2ff   :  { %s361_s17 = smov 128   ;;  %s362_s18 = smov 8  }
 0x300   :  { %243 = dma.vmem_to_hbm [thread:$0]  %s238_s3, 256, %s525_s4, [#allocation3], %s361_s17, %s361_s17, %s362_s18  }
 0x301   :  { %356 = dma.done.wait [#allocation3], 256  }
 0x302   :  { %357 = vsyncadd [#allocation3], 4294967040 }
 0x303   :  { %247 = vsyncpa [#allocation3], 1 }

</bundles_post_ra>
